<compile_context>
chip_gen: v7x
topology: tpu7x:2x2x1
jax: 0.10.0
libtpu: 0.0.40
codegen_flags: <defaults>
</compile_context>

<pallas_src>
import jax
import jax.numpy as jnp
import numpy as np
from jax.experimental import pallas as pl
from jax.experimental.pallas import tpu as pltpu


HIDDEN = 100          # true hidden width of the torch module
HP = 128              # lane-padded hidden width used inside the kernel
NEG_SLOPE = 0.01      # nn.LeakyReLU() default


def _round_up(v, m):
    return ((v + m - 1) // m) * m


def disc_kernel(x_ref, w1_ref, ws_ref, b_ref, wpb_ref, out_ref):
    """6-layer MLP on one (TB, F_raw) batch tile; all weights resident in VMEM."""
    f32 = jnp.float32
    bf16 = jnp.bfloat16

    def leaky(v):
        # max(v, 0.01*v) == LeakyReLU(v) for 0 < slope < 1  (2 VPU ops)
        return jnp.maximum(v, jnp.asarray(NEG_SLOPE, v.dtype) * v)

    # Layer 1: temporal difference is folded into w1 (f32 matmul, f32 accumulate) so the
    # cancellation of large common coordinate offsets happens at f32 precision.
    a1 = jnp.dot(x_ref[...], w1_ref[...], preferred_element_type=f32)
    d1 = leaky(a1.astype(bf16) + b_ref[0:1, :])
    d2 = leaky(jnp.dot(d1, ws_ref[0], preferred_element_type=f32).astype(bf16)
               + b_ref[1:2, :])
    d3 = leaky(jnp.dot(d2, ws_ref[1], preferred_element_type=f32).astype(bf16)
               + b_ref[2:3, :] + d1)
    d4 = (jnp.dot(d3, ws_ref[2], preferred_element_type=f32).astype(bf16)
          + b_ref[3:4, :])                                    # no activation (matches torch)
    dl = leaky(jnp.dot(d4, ws_ref[3], preferred_element_type=f32).astype(bf16)
               + b_ref[4:5, :])
    # final (100 -> 1): VPU multiply + lane reduction -> thin (TB, 1) output
    out_ref[...] = (jnp.sum(dl.astype(f32) * wpb_ref[0:1, :], axis=-1, keepdims=True)
                    + wpb_ref[1:2, 0:1])


def init_params(key, num_joints, win_length):
    """Deterministic PyTorch-style (uniform +-1/sqrt(fan_in)) Linear init."""
    f_in = (win_length - 1) * num_joints * 2
    dims = [(f_in, HIDDEN), (HIDDEN, HIDDEN), (HIDDEN, HIDDEN),
            (HIDDEN, HIDDEN), (HIDDEN, HIDDEN), (HIDDEN, 1)]
    params = []
    for (di, do) in dims:
        key, kw, kb = jax.random.split(key, 3)
        bound = 1.0 / np.sqrt(di)
        w = jax.random.uniform(kw, (di, do), jnp.float32, -bound, bound)
        b = jax.random.uniform(kb, (do,), jnp.float32, -bound, bound)
        params.append((w, b))
    return params


def prepare_params(params, num_joints, win_length):
    """One-time packing: fold temporal diff into w1, zero-pad to 128 lanes, stack weights."""
    (w1, b1), (w2, b2), (w3, b3), (w4, b4), (wl, bl), (wp, bp) = params
    S = num_joints * 2
    f_raw = win_length * S
    f_diff = (win_length - 1) * S
    # Difference matrix D: (x_flat @ D) == flatten(x[:,1:] - x[:,:-1])  (exact; diff is linear).
    D = np.zeros((f_raw, f_diff), np.float32)
    idx = np.arange(f_diff)
    D[idx + S, idx] = 1.0
    D[idx, idx] = -1.0
    w1_eff = jnp.asarray(D) @ w1                                            # (f_raw, HIDDEN) f32
    w1p = jnp.zeros((f_raw, HP), jnp.float32).at[:, :HIDDEN].set(w1_eff)    # f32 (layer-1 stays f32)

    def pad_w(w):
        return (jnp.zeros((HP, HP), jnp.bfloat16)
                .at[:HIDDEN, :HIDDEN].set(w.astype(jnp.bfloat16)))

    ws = jnp.stack([pad_w(w2), pad_w(w3), pad_w(w4), pad_w(wl)])            # (4, HP, HP) bf16

    b_bf16 = jnp.zeros((8, HP), jnp.bfloat16)
    for i, b in enumerate([b1, b2, b3, b4, bl]):
        b_bf16 = b_bf16.at[i, :HIDDEN].set(b.astype(jnp.bfloat16))

    wpb = jnp.zeros((8, HP), jnp.float32)
    wpb = wpb.at[0, :HIDDEN].set(wp[:, 0])                                  # pred weight row
    wpb = wpb.at[1, 0].set(bp[0])                                           # pred bias scalar
    return (w1p, ws, b_bf16, wpb)


def pos2d_discriminator_temp(x, packed, *, batch_tile=2048):
    """x: (B, W, J, 2) float32. Returns (B, 1) float32."""
    w1p, ws, b_bf16, wpb = packed
    B = x.shape[0]
    f_raw = w1p.shape[0]
    # torch: x.squeeze(); x[:,1:]-x[:,:-1]; view(B,-1) -- the diff is folded into w1, so a
    # row-major flatten of the raw window is all the glue that remains (free reshape).
    xf = x.reshape(B, -1)
    if xf.dtype != jnp.float32:
        xf = xf.astype(jnp.float32)
    assert xf.shape[1] == f_raw, (xf.shape, f_raw)

    # Batch tile: as large as batch_tile allows (amortizes ~0.35us/step grid overhead) but
    # bounded by ceil(B/2) so a v7x megacore gets >=2 tiles to shard; multiple of 8 sublanes.
    TB = max(8, min(batch_tile, _round_up(pl.cdiv(B, 2), 8)))
    grid_b = pl.cdiv(B, TB)
    B_pad = grid_b * TB          # output only; input is read with a ragged last block (no pad copy)

    flops = 2 * B * (f_raw * HP + 4 * HP * HP + HP)
    bytes_accessed = (B * f_raw * 4 + B * 4
                      + w1p.size * 4 + ws.size * 2 + b_bf16.size * 2 + wpb.size * 4)
    # Rough VMEM upper bound: x double-buffer + x value + per-layer intermediates + 2x weights.
    vmem_est = (3 * TB * f_raw * 4 + 8 * TB * HP * 4
                + 2 * (w1p.size * 4 + ws.size * 2 + b_bf16.size * 2 + wpb.size * 4)
                + (1 << 20))
    vmem_limit = int(min(max(vmem_est, 32 << 20), 64 << 20))

    out = pl.pallas_call(
        disc_kernel,
        out_shape=jax.ShapeDtypeStruct((B_pad, 1), jnp.float32),
        grid=(grid_b,),
        in_specs=[
            pl.BlockSpec((TB, f_raw), lambda i: (i, 0)),        # x tile (double-buffered)
            pl.BlockSpec((f_raw, HP), lambda i: (0, 0)),        # w1 f32, diff folded (resident)
            pl.BlockSpec((4, HP, HP), lambda i: (0, 0, 0)),     # stacked hidden weights (resident)
            pl.BlockSpec((8, HP), lambda i: (0, 0)),            # stacked bf16 biases (resident)
            pl.BlockSpec((8, HP), lambda i: (0, 0)),            # pred weight row + bias (resident)
        ],
        out_specs=pl.BlockSpec((TB, 1), lambda i: (i, 0)),
        compiler_params=pltpu.CompilerParams(
            dimension_semantics=("parallel",),                  # shard batch across TCs (v7x)
            vmem_limit_bytes=vmem_limit),
        cost_estimate=pl.CostEstimate(flops=flops, transcendentals=0,
                                      bytes_accessed=bytes_accessed),
    )(xf, w1p, ws, b_bf16, wpb)
    return out[:B]


def reference_forward(x, params):
    """Pure-JAX f32 reference mirroring the torch forward, for correctness check."""
    B = x.shape[0]
    xd = x[:, 1:] - x[:, :-1]
    xf = xd.reshape(B, -1)
    (w1, b1), (w2, b2), (w3, b3), (w4, b4), (wl, bl), (wp, bp) = params
    lr = lambda v: jnp.where(v > 0, v, NEG_SLOPE * v)
    d1 = lr(xf @ w1 + b1)
    d2 = lr(d1 @ w2 + b2)
    d3 = lr(d2 @ w3 + b3 + d1)
    d4 = d3 @ w4 + b4
    dl = lr(d4 @ wl + bl)
    return dl @ wp + bp


if __name__ == "__main__":
    # small, module-consistent shapes: win_length=9, num_joints=16 -> raw feature dim 9*16*2=288
    W, J = 9, 16
    key = jax.random.PRNGKey(0)
    kx, kp, kx2 = jax.random.split(key, 3)
    params = init_params(kp, num_joints=J, win_length=W)
    packed = prepare_params(params, num_joints=J, win_length=W)

    # case 1: tiny batch (single tile)
    B = 4
    x = jax.random.normal(kx, (B, W, J, 2), dtype=jnp.float32)
    out = jax.block_until_ready(pos2d_discriminator_temp(x, packed))
    ref = jax.block_until_ready(reference_forward(x, params))
    np.testing.assert_allclose(np.asarray(out), np.asarray(ref), rtol=5e-2, atol=5e-2)
    assert out.shape == (B, 1)

    # case 2: multi-tile grid with a ragged last block (B=20 -> TB=16, grid=2)
    B2 = 20
    x2 = jax.random.normal(kx2, (B2, W, J, 2), dtype=jnp.float32)
    out2 = jax.block_until_ready(pos2d_discriminator_temp(x2, packed))
    ref2 = jax.block_until_ready(reference_forward(x2, params))
    np.testing.assert_allclose(np.asarray(out2), np.asarray(ref2), rtol=5e-2, atol=5e-2)
    assert out2.shape == (B2, 1)

    print("KERNEL_OK")
</pallas_src>

<mosaic_0001>
module attributes {stable_mosaic.version = 11 : i64} {
  func.func @disc_kernel(%arg0: i32, %arg1: memref<8x288xf32, #tpu.memory_space<vmem>>, %arg2: memref<288x128xf32, #tpu.memory_space<vmem>>, %arg3: memref<4x128x128xbf16, #tpu.memory_space<vmem>>, %arg4: memref<8x128xbf16, #tpu.memory_space<vmem>>, %arg5: memref<8x128xf32, #tpu.memory_space<vmem>>, %arg6: memref<8x1xf32, #tpu.memory_space<vmem>>) attributes {dimension_semantics = [#tpu.dimension_semantics<parallel>], iteration_bounds = array<i64: 1>, scalar_prefetch = 0 : i64, scratch_operands = 0 : i64, tpu.core_type = #tpu.core_type<tc>, window_params = [{transform_indices = @transform_0, window_bounds = array<i64: 8, 288>}, {pipeline_mode = #tpu.pipeline_mode<synchronous>, transform_indices = @transform_1, window_bounds = array<i64: 288, 128>}, {pipeline_mode = #tpu.pipeline_mode<synchronous>, transform_indices = @transform_2, window_bounds = array<i64: 4, 128, 128>}, {pipeline_mode = #tpu.pipeline_mode<synchronous>, transform_indices = @transform_3, window_bounds = array<i64: 8, 128>}, {pipeline_mode = #tpu.pipeline_mode<synchronous>, transform_indices = @transform_4, window_bounds = array<i64: 8, 128>}, {transform_indices = @transform_5, window_bounds = array<i64: 8, 1>}]} {
    %c0 = arith.constant 0 : index
    %c0_0 = arith.constant 0 : index
    %0 = vector.load %arg1[%c0, %c0_0] : memref<8x288xf32, #tpu.memory_space<vmem>>, vector<8x288xf32>
    %c0_1 = arith.constant 0 : index
    %c0_2 = arith.constant 0 : index
    %1 = vector.load %arg2[%c0_1, %c0_2] : memref<288x128xf32, #tpu.memory_space<vmem>>, vector<288x128xf32>
    %cst = arith.constant dense<0.000000e+00> : vector<8x128xf32>
    %2 = tpu.matmul %0, %1, %cst {dimension_numbers = #tpu.dot_dimension_numbers<[1], [0], [0], [1], [0, 0, 1, 1], [], []>} : vector<8x288xf32>, vector<288x128xf32>, vector<8x128xf32> -> vector<8x128xf32>
    %3 = arith.truncf %2 : vector<8x128xf32> to vector<8x128xbf16>
    %c0_3 = arith.constant 0 : index
    %c0_4 = arith.constant 0 : index
    %4 = vector.load %arg4[%c0_3, %c0_4] : memref<8x128xbf16, #tpu.memory_space<vmem>>, vector<1x128xbf16>
    %5 = vector.broadcast %4 : vector<1x128xbf16> to vector<8x128xbf16>
    %6 = arith.addf %3, %5 : vector<8x128xbf16>
    %cst_5 = arith.constant 1.000980e-02 : bf16
    %7 = vector.broadcast %cst_5 : bf16 to vector<8x128xbf16>
    %8 = arith.mulf %7, %6 : vector<8x128xbf16>
    %9 = arith.maximumf %6, %8 : vector<8x128xbf16>
    %c0_6 = arith.constant 0 : index
    %c0_7 = arith.constant 0 : index
    %c0_8 = arith.constant 0 : index
    %10 = vector.load %arg3[%c0_6, %c0_7, %c0_8] : memref<4x128x128xbf16, #tpu.memory_space<vmem>>, vector<1x128x128xbf16>
    %11 = vector.shape_cast %10 : vector<1x128x128xbf16> to vector<128x128xbf16>
    %cst_9 = arith.constant dense<0.000000e+00> : vector<8x128xf32>
    %12 = tpu.matmul %9, %11, %cst_9 {dimension_numbers = #tpu.dot_dimension_numbers<[1], [0], [0], [1], [0, 0, 1, 1], [], []>} : vector<8x128xbf16>, vector<128x128xbf16>, vector<8x128xf32> -> vector<8x128xf32>
    %13 = arith.truncf %12 : vector<8x128xf32> to vector<8x128xbf16>
    %c1 = arith.constant 1 : index
    %c0_10 = arith.constant 0 : index
    %14 = vector.load %arg4[%c1, %c0_10] : memref<8x128xbf16, #tpu.memory_space<vmem>>, vector<1x128xbf16>
    %15 = vector.broadcast %14 : vector<1x128xbf16> to vector<8x128xbf16>
    %16 = arith.addf %13, %15 : vector<8x128xbf16>
    %cst_11 = arith.constant 1.000980e-02 : bf16
    %17 = vector.broadcast %cst_11 : bf16 to vector<8x128xbf16>
    %18 = arith.mulf %17, %16 : vector<8x128xbf16>
    %19 = arith.maximumf %16, %18 : vector<8x128xbf16>
    %c1_12 = arith.constant 1 : index
    %c0_13 = arith.constant 0 : index
    %c0_14 = arith.constant 0 : index
    %20 = vector.load %arg3[%c1_12, %c0_13, %c0_14] : memref<4x128x128xbf16, #tpu.memory_space<vmem>>, vector<1x128x128xbf16>
    %21 = vector.shape_cast %20 : vector<1x128x128xbf16> to vector<128x128xbf16>
    %cst_15 = arith.constant dense<0.000000e+00> : vector<8x128xf32>
    %22 = tpu.matmul %19, %21, %cst_15 {dimension_numbers = #tpu.dot_dimension_numbers<[1], [0], [0], [1], [0, 0, 1, 1], [], []>} : vector<8x128xbf16>, vector<128x128xbf16>, vector<8x128xf32> -> vector<8x128xf32>
    %23 = arith.truncf %22 : vector<8x128xf32> to vector<8x128xbf16>
    %c2 = arith.constant 2 : index
    %c0_16 = arith.constant 0 : index
    %24 = vector.load %arg4[%c2, %c0_16] : memref<8x128xbf16, #tpu.memory_space<vmem>>, vector<1x128xbf16>
    %25 = vector.broadcast %24 : vector<1x128xbf16> to vector<8x128xbf16>
    %26 = arith.addf %23, %25 : vector<8x128xbf16>
    %27 = arith.addf %26, %9 : vector<8x128xbf16>
    %cst_17 = arith.constant 1.000980e-02 : bf16
    %28 = vector.broadcast %cst_17 : bf16 to vector<8x128xbf16>
    %29 = arith.mulf %28, %27 : vector<8x128xbf16>
    %30 = arith.maximumf %27, %29 : vector<8x128xbf16>
    %c2_18 = arith.constant 2 : index
    %c0_19 = arith.constant 0 : index
    %c0_20 = arith.constant 0 : index
    %31 = vector.load %arg3[%c2_18, %c0_19, %c0_20] : memref<4x128x128xbf16, #tpu.memory_space<vmem>>, vector<1x128x128xbf16>
    %32 = vector.shape_cast %31 : vector<1x128x128xbf16> to vector<128x128xbf16>
    %cst_21 = arith.constant dense<0.000000e+00> : vector<8x128xf32>
    %33 = tpu.matmul %30, %32, %cst_21 {dimension_numbers = #tpu.dot_dimension_numbers<[1], [0], [0], [1], [0, 0, 1, 1], [], []>} : vector<8x128xbf16>, vector<128x128xbf16>, vector<8x128xf32> -> vector<8x128xf32>
    %34 = arith.truncf %33 : vector<8x128xf32> to vector<8x128xbf16>
    %c3 = arith.constant 3 : index
    %c0_22 = arith.constant 0 : index
    %35 = vector.load %arg4[%c3, %c0_22] : memref<8x128xbf16, #tpu.memory_space<vmem>>, vector<1x128xbf16>
    %36 = vector.broadcast %35 : vector<1x128xbf16> to vector<8x128xbf16>
    %37 = arith.addf %34, %36 : vector<8x128xbf16>
    %c3_23 = arith.constant 3 : index
    %c0_24 = arith.constant 0 : index
    %c0_25 = arith.constant 0 : index
    %38 = vector.load %arg3[%c3_23, %c0_24, %c0_25] : memref<4x128x128xbf16, #tpu.memory_space<vmem>>, vector<1x128x128xbf16>
    %39 = vector.shape_cast %38 : vector<1x128x128xbf16> to vector<128x128xbf16>
    %cst_26 = arith.constant dense<0.000000e+00> : vector<8x128xf32>
    %40 = tpu.matmul %37, %39, %cst_26 {dimension_numbers = #tpu.dot_dimension_numbers<[1], [0], [0], [1], [0, 0, 1, 1], [], []>} : vector<8x128xbf16>, vector<128x128xbf16>, vector<8x128xf32> -> vector<8x128xf32>
    %41 = arith.truncf %40 : vector<8x128xf32> to vector<8x128xbf16>
    %c4 = arith.constant 4 : index
    %c0_27 = arith.constant 0 : index
    %42 = vector.load %arg4[%c4, %c0_27] : memref<8x128xbf16, #tpu.memory_space<vmem>>, vector<1x128xbf16>
    %43 = vector.broadcast %42 : vector<1x128xbf16> to vector<8x128xbf16>
    %44 = arith.addf %41, %43 : vector<8x128xbf16>
    %cst_28 = arith.constant 1.000980e-02 : bf16
    %45 = vector.broadcast %cst_28 : bf16 to vector<8x128xbf16>
    %46 = arith.mulf %45, %44 : vector<8x128xbf16>
    %47 = arith.maximumf %44, %46 : vector<8x128xbf16>
    %48 = arith.extf %47 : vector<8x128xbf16> to vector<8x128xf32>
    %c0_29 = arith.constant 0 : index
    %c0_30 = arith.constant 0 : index
    %49 = vector.load %arg5[%c0_29, %c0_30] : memref<8x128xf32, #tpu.memory_space<vmem>>, vector<1x128xf32>
    %50 = vector.broadcast %49 : vector<1x128xf32> to vector<8x128xf32>
    %51 = arith.mulf %48, %50 : vector<8x128xf32>
    %cst_31 = arith.constant dense<0.000000e+00> : vector<8xf32>
    %52 = vector.multi_reduction <add>, %51, %cst_31 [1] : vector<8x128xf32> to vector<8xf32>
    %53 = vector.shape_cast %52 : vector<8xf32> to vector<8x1xf32>
    %c1_32 = arith.constant 1 : index
    %c0_33 = arith.constant 0 : index
    %54 = vector.load %arg5[%c1_32, %c0_33] : memref<8x128xf32, #tpu.memory_space<vmem>>, vector<1x1xf32>
    %55 = vector.broadcast %54 : vector<1x1xf32> to vector<8x1xf32>
    %56 = arith.addf %53, %55 : vector<8x1xf32>
    %c0_34 = arith.constant 0 : index
    %c0_35 = arith.constant 0 : index
    %57 = vector.load %arg6[%c0_34, %c0_35] : memref<8x1xf32, #tpu.memory_space<vmem>>, vector<8x1xf32>
    tpu.vector_store %arg6[%c0_34, %c0_35], %56 {strides = array<i32>} : memref<8x1xf32, #tpu.memory_space<vmem>>, vector<8x1xf32>,
    return
  }
  func.func @transform_0(%arg0: i32) -> (i32, i32) {
    %c0_i32 = arith.constant 0 : i32
    %c0_i32_0 = arith.constant 0 : i32
    return %arg0, %c0_i32 : i32, i32
  }
  func.func @transform_1(%arg0: i32) -> (i32, i32) {
    %c0_i32 = arith.constant 0 : i32
    %c0_i32_0 = arith.constant 0 : i32
    %c0_i32_1 = arith.constant 0 : i32
    return %c0_i32, %c0_i32_0 : i32, i32
  }
  func.func @transform_2(%arg0: i32) -> (i32, i32, i32) {
    %c0_i32 = arith.constant 0 : i32
    %c0_i32_0 = arith.constant 0 : i32
    %c0_i32_1 = arith.constant 0 : i32
    %c0_i32_2 = arith.constant 0 : i32
    return %c0_i32, %c0_i32_0, %c0_i32_1 : i32, i32, i32
  }
  func.func @transform_3(%arg0: i32) -> (i32, i32) {
    %c0_i32 = arith.constant 0 : i32
    %c0_i32_0 = arith.constant 0 : i32
    %c0_i32_1 = arith.constant 0 : i32
    return %c0_i32, %c0_i32_0 : i32, i32
  }
  func.func @transform_4(%arg0: i32) -> (i32, i32) {
    %c0_i32 = arith.constant 0 : i32
    %c0_i32_0 = arith.constant 0 : i32
    %c0_i32_1 = arith.constant 0 : i32
    return %c0_i32, %c0_i32_0 : i32, i32
  }
  func.func @transform_5(%arg0: i32) -> (i32, i32) {
    %c0_i32 = arith.constant 0 : i32
    %c0_i32_0 = arith.constant 0 : i32
    return %arg0, %c0_i32 : i32, i32
  }
}

</mosaic_0001>

<bundles_post_ra>
// kernel: tpu_custom_call.1
= control target key start
LH: loop header
LB: loop body
LE: loop exit
PB: predicated region body
PF: predicated region fallthrough
CT: control target
= control target key end

     0   :  { %10 = vsyncpa [#allocation3], 0  ;;  %s1259_s0 = inlined_call_operand.hbm [shape: f32[4,288], index: 0, kind: input, shape index: {}]   ;;  %s1260_s1 = inlined_call_operand.hbm [shape: f32[288,128], index: 1, kind: input, shape index: {}]   ;;  %s1261_s2 = inlined_call_operand.hbm [shape: bf16[4,128,128], index: 2, kind: input, shape index: {}]   ;;  %s1262_s3 = inlined_call_operand.vmem [shape: bf16[8,128], index: 3, kind: input, shape index: {}]   ;;  %s1263_s4 = inlined_call_operand.vmem [shape: f32[8,128], index: 4, kind: input, shape index: {}]   ;;  %s1264_s5 = inlined_call_operand.vmem [shape: f32[8,1], index: 5, kind: output, shape index: {}]  }
   0x1   :  { %11 = vsyncpa [#allocation5], 0 }
   0x2   :  { %16 = vsyncadd [#allocation3], 192  ;;  %s1112_s18 = smov [#allocation4]   ;;  %s1042_s22 = scalar_lea.hbm %s1260_s1, 4608 }
   0x3   :  { %s29_s19 = sshll.u32 %s1112_s18, 4  ;;  %p1043_p0 = scmp.ne.s32.totalorder %s1260_s1, %s1042_s22  ;;  %s30_s19 = int_to_ptr.vmem [resolvable:$true] %s29_s19 }
   0x4   :  { %p1046_p1 = scmp.lt.u32.totalorder %s1042_s22, %s1260_s1 }
   0x6   :  { %p1048_p2 = pnand %p1046_p1, %p1043_p0 }
   0x8   :  { %1051 = shalt.err (!%p1048_p2)
}
   0x9   :  { %s1052_s27 = scalar_lea.vmem %s30_s19, 4608  ;;  %p1057_p4 = scmp.lt.s32.totalorder %s30_s19, %s30_s19 }
   0xa   :  { %p1053_p3 = scmp.ne.s32.totalorder %s30_s19, %s1052_s27  ;;  %p1058_p5 = scmp.lt.s32.totalorder %s1052_s27, %s1052_s27 }
   0xc   :  { %p1059_p6 = por %p1058_p5, %p1057_p4 }
   0xe   :  { %p1060_p7 = pnand %p1059_p6, %p1053_p3 }
  0x10   :  { %1063 = shalt.err (!%p1060_p7)
}
  0x11   :  { %s1113_s28 = smov 128   ;;  %s1114_s29 = smov 8  }
  0x12   :  { %35 = dma.hbm_to_vmem [thread:$0]  %s1260_s1, 4608, %s30_s19, [#allocation5], %s1113_s28, %s1113_s28, %s1114_s29  }
  0x13   :  { %s1115_s7 = smov [#allocation2]   ;;  %s1064_s11 = scalar_lea.hbm %s1259_s0, 192 }
  0x14   :  { %s17_s8 = sshll.u32 %s1115_s7, 4  ;;  %p1065_p8 = scmp.ne.s32.totalorder %s1259_s0, %s1064_s11  ;;  %s18_s8 = int_to_ptr.vmem [resolvable:$true] %s17_s8 }
  0x15   :  { %p1068_p9 = scmp.lt.u32.totalorder %s1064_s11, %s1259_s0 }
  0x17   :  { %p1070_p10 = pnand %p1068_p9, %p1065_p8 }
  0x19   :  { %1073 = shalt.err (!%p1070_p10)
}
  0x1a   :  { %s1074_s16 = scalar_lea.vmem %s18_s8, 192  ;;  %s1078_s1 = scalar_lea.vmem %s18_s8, 384 }
  0x1b   :  { %p1075_p11 = scmp.ne.s32.totalorder %s18_s8, %s1074_s16  ;;  %p1079_p12 = scmp.lt.s32.totalorder %s18_s8, %s18_s8 }
  0x1c   :  { %p1080_p13 = scmp.lt.s32.totalorder %s1078_s1, %s1074_s16 }
  0x1e   :  { %p1081_p0 = por %p1080_p13, %p1079_p12 }
  0x20   :  { %p1082_p1 = pnand %p1081_p0, %p1075_p11 }
  0x22   :  { %1085 = shalt.err (!%p1082_p1)
}
  0x23   :  { %s1116_s17 = smov 192   ;;  %s1117_s18 = smov 12  }
  0x24   :  { %23 = dma.hbm_to_vmem [thread:$0]  %s1259_s0, 192, %s18_s8, [#allocation3], %s1116_s17, %s1116_s17, %s1117_s18  }
  0x25   :  { %s1118_s21 = smov [#allocation6]   ;;  %s1086_s25 = scalar_lea.hbm %s1261_s2, 4096 }
  0x26   :  { %s41_s22 = sshll.u32 %s1118_s21, 4  ;;  %p1087_p2 = scmp.ne.s32.totalorder %s1261_s2, %s1086_s25  ;;  %s42_s22 = int_to_ptr.vmem [resolvable:$true] %s41_s22 }
  0x27   :  { %p1090_p3 = scmp.lt.u32.totalorder %s1086_s25, %s1261_s2 }
  0x29   :  { %p1092_p4 = pnand %p1090_p3, %p1087_p2 }
  0x2b   :  { %1095 = shalt.err (!%p1092_p4)
}
  0x2c   :  { %s1096_s30 = scalar_lea.vmem %s42_s22, 4096  ;;  %p1101_p6 = scmp.lt.s32.totalorder %s42_s22, %s42_s22 }
  0x2d   :  { %p1097_p5 = scmp.ne.s32.totalorder %s42_s22, %s1096_s30  ;;  %p1102_p7 = scmp.lt.s32.totalorder %s1096_s30, %s1096_s30 }
  0x2f   :  { %p1103_p8 = por %p1102_p7, %p1101_p6 }
  0x31   :  { %p1104_p9 = pnand %p1103_p8, %p1097_p5 }
  0x33   :  { %1107 = shalt.err (!%p1104_p9)
}
  0x34   :  { %s1119_s0 = smov 64   ;;  %s1120_s6 = smov 4  }
  0x35   :  { %47 = dma.hbm_to_vmem [thread:$0]  %s1261_s2, 4096, %s42_s22, [#allocation5], %s1119_s0, %s1119_s0, %s1120_s6  }
  0x36   :  { %1108 = dma.done.wait [#allocation3], 384  }
  0x37   :  { %1109 = vsyncadd [#allocation3], 4294966912 }
  0x38   :  { %1110 = dma.done.wait [#allocation5], 8704  }
  0x39   :  { %1111 = vsyncadd [#allocation5], 4294958592  ;;  %v1121_v0 = vmov 0.0|0.0   ;;  %vm1122_vm0 = vmmov 0   ;;  %v1123_v1 = vmov 0.0   ;;  %v83_v2 = vld [vmem:[#allocation4 + $0x80] sm:$0xff] }
  0x3a   :  { %988 = vmatprep.subr.bf16.mxu1 %v1121_v0  ;;  %873 = vmatprep.mubr.msk.f32.mxu1 %vm1122_vm0, %v1123_v1  ;;  %v84_v3 = vld [vmem:[#allocation4 + $0x88] sm:$0xff]  ;;  %v67_v4 = vld [vmem:[#allocation4] sm:$0xff]  ;;  %v85_v7 = vld [vmem:[#allocation4 + $0x90] sm:$0xff]  ;;  %vm112_vm1 = vcmask 261120   ;;  %vm746_vm2 = vcmask 7168  }
  0x3b   :  { %v956_v5 = vpack.c.bf16 %v84_v3, %v83_v2  ;;  %v68_v6 = vld [vmem:[#allocation4 + $0x8] sm:$0xff]  ;;  %v86_v8 = vld [vmem:[#allocation4 + $0x98] sm:$0xff]  ;;  %v69_v11 = vld [vmem:[#allocation4 + $0x10] sm:$0xff] }
  0x3c   :  { %v958_v9 = vpack.c.bf16 %v68_v6, %v67_v4  ;;  %v960_v10 = vpack.c.bf16 %v86_v8, %v85_v7  ;;  %v70_v12 = vld [vmem:[#allocation4 + $0x18] sm:$0xff]  ;;  %v87_v13 = vld [vmem:[#allocation4 + $0xa0] sm:$0xff]  ;;  %v88_v14 = vld [vmem:[#allocation4 + $0xa8] sm:$0xff] }
  0x3d   :  { %957 = vmatprep.subr.bf16.mxu0 %v956_v5  ;;  %v962_v15 = vpack.c.bf16 %v70_v12, %v69_v11  ;;  %v964_v16 = vpack.c.bf16 %v88_v14, %v87_v13  ;;  %v71_v17 = vld [vmem:[#allocation4 + $0x20] sm:$0xff]  ;;  %v72_v18 = vld [vmem:[#allocation4 + $0x28] sm:$0xff]  ;;  %v89_v19 = vld [vmem:[#allocation4 + $0xb0] sm:$0xff]  ;;  %v260_v12 = vlaneseq }
  0x3e   :  { %959 = vmatpush3.bf16.msra.mxu0 %v958_v9  ;;  %v90_v20 = vld [vmem:[#allocation4 + $0xb8] sm:$0xff]  ;;  %v966_v21 = vpack.c.bf16 %v72_v18, %v71_v17  ;;  %v73_v22 = vld [vmem:[#allocation4 + $0x30] sm:$0xff]  ;;  %v99_v25 = vld [vmem:[#allocation4 + $0x100] sm:$0xff] }
  0x3f   :  { %961 = vmatprep.subr.bf16.mxu0 %v960_v10  ;;  %v968_v23 = vpack.c.bf16 %v90_v20, %v89_v19  ;;  %v74_v24 = vld [vmem:[#allocation4 + $0x38] sm:$0xff]  ;;  %v100_v26 = vld [vmem:[#allocation4 + $0x108] sm:$0xff]  ;;  %v91_v27 = vld [vmem:[#allocation4 + $0xc0] sm:$0xff]  ;;  %v1212_v13 = vshrl.u32 %v260_v12, 7 }
  0x40   :  { %v92_v28 = vld [vmem:[#allocation4 + $0xc8] sm:$0xff]  ;;  %v989_v29 = vpack.c.bf16 %v100_v26, %v99_v25  ;;  %v75_v30 = vld [vmem:[#allocation4 + $0x40] sm:$0xff]  ;;  %v970_v32 = vpack.c.bf16 %v74_v24, %v73_v22  ;;  %v93_v33 = vld [vmem:[#allocation4 + $0xd0] sm:$0xff] }
  0x41   :  { %v76_v31 = vld [vmem:[#allocation4 + $0x48] sm:$0xff]  ;;  %v101_v35 = vld [vmem:[#allocation4 + $0x110] sm:$0xff]  ;;  %v972_v36 = vpack.c.bf16 %v92_v28, %v91_v27  ;;  %v102_v37 = vld [vmem:[#allocation4 + $0x118] sm:$0xff]  ;;  %v262_v17 = vsub.s32 0, %v1212_v13 }
  0x42   :  { %963 = vmatpush3.bf16.msra.mxu0 %v962_v15  ;;  %990 = vmatpush3.bf16.msra.mxu1 %v989_v29  ;;  %v1008_v34 = vld [vmem:[#allocation2 + $0x4] ss:$12 sps:$4 sm:$0xff]   ;;  %v992_v39 = vpack.c.bf16 %v102_v37, %v101_v35  ;;  %v77_v40 = vld [vmem:[#allocation4 + $0x50] sm:$0xff]  ;;  %v974_v43 = vpack.c.bf16 %v76_v31, %v75_v30  ;;  %v1010_v44 = vld [vmem:[#allocation6] sm:$0xff]  }
  0x43   :  { %965 = vmatprep.subr.bf16.mxu0 %v964_v16  ;;  %991 = vmatprep.subr.bf16.mxu1 %v1121_v0  ;;  %v94_v38 = vld [vmem:[#allocation4 + $0xd8] sm:$0xff]  ;;  %v95_v46 = vld [vmem:[#allocation4 + $0xe0] sm:$0xff]  ;;  %v96_v47 = vld [vmem:[#allocation4 + $0xe8] sm:$0xff] }
  0x44   :  { %179 = vmatprep.mubr.f32.mxu0 %v1008_v34  ;;  %v78_v41 = vld [vmem:[#allocation4 + $0x58] sm:$0xff]  ;;  %v976_v45 = vpack.c.bf16 %v94_v38, %v93_v33  ;;  %v79_v48 = vld [vmem:[#allocation4 + $0x60] sm:$0xff]  ;;  %v80_v49 = vld [vmem:[#allocation4 + $0x68] sm:$0xff]  ;;  %v980_v54 = vpack.c.bf16 %v96_v47, %v95_v46 }
  0x45   :  { %v1009_v42 = vld [vmem:[#allocation2 + $0x8] ss:$12 sps:$4 sm:$0xff]   ;;  %v1011_v50 = vld [vmem:[#allocation6 + $0x8] sm:$0xff]   ;;  %v978_v51 = vpack.c.bf16 %v78_v41, %v77_v40  ;;  %v982_v58 = vpack.c.bf16 %v80_v49, %v79_v48  ;;  %v1014_v63 = vld [vmem:[#allocation6 + $0x20] sm:$0xff]  }
  0x46   :  { %967 = vmatpush3.bf16.msra.mxu0 %v966_v21  ;;  %993 = vmatpush3.bf16.msra.mxu1 %v992_v39  ;;  %v97_v52 = vld [vmem:[#allocation4 + $0xf0] sm:$0xff]  ;;  %v98_v53 = vld [vmem:[#allocation4 + $0xf8] sm:$0xff]  ;;  %v1015_v0 = vld [vmem:[#allocation6 + $0x28] sm:$0xff]  }
  0x47   :  { %969 = vmatprep.subr.bf16.mxu0 %v968_v23  ;;  %876 = vmatprep.subr.bf16.mxu1 %v1123_v1  ;;  %v1012_v55 = vld [vmem:[#allocation6 + $0x10] sm:$0xff]   ;;  %v82_v57 = vld [vmem:[#allocation4 + $0x78] sm:$0xff]  ;;  %v984_v59 = vpack.c.bf16 %v98_v53, %v97_v52  ;;  %v1018_v4 = vld [vmem:[#allocation6 + $0x40] sm:$0xff]  }
  0x48   :  { %v81_v56 = vld [vmem:[#allocation4 + $0x70] sm:$0xff]  ;;  %v1013_v60 = vld [vmem:[#allocation6 + $0x18] sm:$0xff]   ;;  %v1019_v5 = vld [vmem:[#allocation6 + $0x48] sm:$0xff]  }
  0x49   :  { %874 = vmatmul.mubr.msk.f32.vlgmr.msra.gmra.mrb[0].mxu1 %vm112_vm1, %v1009_v42  ;;  %v986_v61 = vpack.c.bf16 %v82_v57, %v81_v56  ;;  %v1006_v62 = vld [vmem:[#allocation2] ss:$12 sps:$4 sm:$0xff]   ;;  %v1017_v3 = vld [vmem:[#allocation6 + $0x38] sm:$0xff]   ;;  %v1022_v8 = vld [vmem:[#allocation6 + $0x60] sm:$0xff]   ;;  %v494_v56 = vsub.s32 1, %v1212_v13 }
  0x4a   :  { %971 = vmatpush3.bf16.msra.mxu0 %v970_v32  ;;  %877 = vmatpush3.bf16.msra.mxu1 %v1010_v44  ;;  %v1016_v2 = vld [vmem:[#allocation6 + $0x30] sm:$0xff]   ;;  %v1021_v7 = vld [vmem:[#allocation6 + $0x58] sm:$0xff]   ;;  %v1023_v9 = vld [vmem:[#allocation6 + $0x68] sm:$0xff]  }
  0x4b   :  { %973 = vmatprep.subr.bf16.mxu0 %v972_v36  ;;  %878 = vmatprep.subr.bf16.mxu1 %v1123_v1  ;;  %v1020_v6 = vld [vmem:[#allocation6 + $0x50] sm:$0xff]   ;;  %v256_v14 = vld [vmem:[%s1262_s3] sm:$0x1]  ;;  %v1025_v27 = vld [vmem:[#allocation6 + $0x78] sm:$0xff]  }
  0x4c   :  { %892 = vmatprep.mubr.msk.bf16.mxu1 %vm1122_vm0, %v1123_v1  ;;  %v258_v16 = vpack.i.b16 %v256_v14, %v256_v14  ;;  %v1024_v26 = vld [vmem:[#allocation6 + $0x70] sm:$0xff]   ;;  %v1026_v28 = vld [vmem:[#allocation6 + $0x80] sm:$0xff]   ;;  %v1027_v29 = vld [vmem:[#allocation6 + $0x88] sm:$0xff]   ;;  %v372_v33 = vshrl.u32 %v256_v14, 16 }
  0x4d   :  { %v1028_v30 = vld [vmem:[#allocation6 + $0x90] sm:$0xff]   ;;  %v1029_v31 = vld [vmem:[#allocation6 + $0x98] sm:$0xff]   ;;  %v1030_v32 = vld [vmem:[#allocation6 + $0xa0] sm:$0xff]  }
  0x4e   :  { %975 = vmatpush3.bf16.msra.mxu0 %v974_v43  ;;  %879 = vmatpush3.bf16.msra.mxu1 %v1011_v50  ;;  %v263_v21 = vrot.slane %v258_v16, %v262_v17  ;;  %v373_v34 = vpack.i.b16 %v372_v33, %v372_v33  ;;  %v1031_v44 = vld [vmem:[#allocation6 + $0xa8] sm:$0xff]   ;;  %v1033_v46 = vld [vmem:[#allocation6 + $0xb8] sm:$0xff]   ;;  %v1034_v47 = vld [vmem:[#allocation6 + $0xc0] sm:$0xff]   ;;  %v726_v16 = vsub.s32 2, %v1212_v13 }
  0x4f   :  { %977 = vmatprep.subr.bf16.mxu0 %v976_v45  ;;  %880 = vmatprep.subr.bf16.mxu1 %v1123_v1  ;;  %v1032_v45 = vld [vmem:[#allocation6 + $0xb0] sm:$0xff]   ;;  %v1035_v48 = vld [vmem:[#allocation6 + $0xc8] sm:$0xff]   ;;  %v1037_v50 = vld [vmem:[#allocation6 + $0xd8] sm:$0xff]  }
  0x50   :  { %v378_v35 = vrot.slane %v373_v34, %v262_v17  ;;  %v1036_v49 = vld [vmem:[#allocation6 + $0xd0] sm:$0xff]   ;;  %v1039_v52 = vld [vmem:[#allocation6 + $0xe8] sm:$0xff]  }
  0x51   :  { %v1040_v53 = vld [vmem:[#allocation6 + $0xf0] sm:$0xff]   ;;  %v720_v14 = vld [vmem:[%s1262_s3] sm:$0x4]  ;;  %v788_v13 = vld [vmem:[%s1263_s4 + $0x1] ss:$0 sm:$0xff] }
  0x52   :  { %979 = vmatpush3.bf16.msra.mxu0 %v978_v51  ;;  %881 = vmatpush3.bf16.msra.mxu1 %v1012_v55  ;;  %v1038_v51 = vld [vmem:[#allocation6 + $0xe0] sm:$0xff]  }
  0x53   :  { %981 = vmatprep.subr.bf16.mxu0 %v980_v54  ;;  %882 = vmatprep.subr.bf16.mxu1 %v1123_v1  ;;  %v488_v54 = vld [vmem:[%s1262_s3] sm:$0x2] }
  0x54   :  { %v490_v55 = vpack.i.b16 %v488_v54, %v488_v54 }
  0x56   :  { %983 = vmatpush3.bf16.msra.mxu0 %v982_v58  ;;  %883 = vmatpush3.bf16.msra.mxu1 %v1013_v60  ;;  %v495_v57 = vrot.slane %v490_v55, %v494_v56 }
  0x57   :  { %985 = vmatprep.subr.bf16.mxu0 %v984_v59  ;;  %884 = vmatprep.subr.bf16.mxu1 %v1123_v1 }
  0x5a   :  { %987 = vmatpush3.bf16.msra.mxu0 %v986_v61  ;;  %885 = vmatpush3.bf16.msra.mxu1 %v1014_v63 }
  0x5b   :  { %896 = vmatprep.subr.bf16.mxu0 %v1123_v1  ;;  %886 = vmatprep.subr.bf16.mxu1 %v1123_v1 }
  0x5d   :  { %180 = vmatmul.mubr.f32.vlgmr.msra.gmra.mrb[0].mxu0 %v1006_v62 }
  0x5e   :  { %912 = vmatprep.mubr.msk.bf16.mxu0 %vm1122_vm0, %v1123_v1  ;;  %887 = vmatpush3.bf16.msra.mxu1 %v1015_v0 }
  0x5f   :  { %888 = vmatprep.subr.bf16.mxu1 %v1123_v1  ;;  %897 = vmatpush3.bf16.msra.mxu0 %v1018_v4  ;;  %v606_v4 = vshrl.u32 %v488_v54, 16 }
  0x60   :  { %898 = vmatprep.subr.bf16.mxu0 %v1123_v1 }
  0x62   :  { %889 = vmatpush3.bf16.msra.mxu1 %v1016_v2 }
  0x63   :  { %890 = vmatprep.subr.bf16.mxu1 %v1123_v1  ;;  %899 = vmatpush3.bf16.msra.mxu0 %v1019_v5  ;;  %v607_v5 = vpack.i.b16 %v606_v4, %v606_v4 }
  0x64   :  { %900 = vmatprep.subr.bf16.mxu0 %v1123_v1 }
  0x66   :  { %891 = vmatpush3.bf16.msra.mxu1 %v1017_v3 }
  0x67   :  { %916 = vmatprep.subr.bf16.mxu1 %v1123_v1  ;;  %901 = vmatpush3.bf16.msra.mxu0 %v1020_v6  ;;  %v612_v6 = vrot.slane %v607_v5, %v494_v56 }
  0x68   :  { %902 = vmatprep.subr.bf16.mxu0 %v1123_v1 }
  0x6b   :  { %903 = vmatpush3.bf16.msra.mxu0 %v1021_v7 }
  0x6c   :  { %904 = vmatprep.subr.bf16.mxu0 %v1123_v1 }
  0x6f   :  { %905 = vmatpush3.bf16.msra.mxu0 %v1022_v8 }
  0x70   :  { %906 = vmatprep.subr.bf16.mxu0 %v1123_v1 }
  0x73   :  { %907 = vmatpush3.bf16.msra.mxu0 %v1023_v9 }
  0x74   :  { %908 = vmatprep.subr.bf16.mxu0 %v1123_v1 }
  0x77   :  { %909 = vmatpush3.bf16.msra.mxu0 %v1024_v26  ;;  %v787_v26 = vld [vmem:[%s1263_s4] ss:$0 sm:$0xff] }
  0x78   :  { %910 = vmatprep.subr.bf16.mxu0 %v1123_v1 }
  0x7b   :  { %911 = vmatpush3.bf16.msra.mxu0 %v1025_v27 }
  0x7c   :  { %936 = vmatprep.subr.bf16.mxu0 %v1123_v1 }
 0x11c   :  { %v251_v10 = vpop.f32.mrb[0].mxu1 }
 0x11d   :  { %v875_v11 = vpop.f32.mrb[1].mxu1 }
 0x130   :  { %v821_v15 = vpop.f32.mrb[0].mxu0 }
 0x131   :  { %v822_v18 = vpop.f32.mrb[1].mxu0 }
 0x132   :  { %v823_v19 = vadd.f32 %v822_v18, %v821_v15  ;;  %v722_v15 = vpack.i.b16 %v720_v14, %v720_v14 }
 0x134   :  { %v252_v20 = vadd.f32 %v823_v19, %v251_v10  ;;  %v727_v17 = vrot.slane %v722_v15, %v726_v16 }
 0x136   :  { %v255_v22 = vpack.c.bf16 %v252_v20, %v252_v20 }
 0x138   :  { %v264_v23 = vadd.bf16 %v263_v21, %v255_v22 }
 0x13a   :  { %v265_v24 = vmul.bf16 1009007652, %v264_v23 }
 0x13c   :  { %v1218_v25 = vmax.bf16 %v265_v24, %v264_v23 }
 0x13e   :  { %893 = vmatmul.mubr.bf16.vlgmr.msra.gmra.mrb[4].mxu1 %v1218_v25 }
 0x13f   :  { %932 = vmatprep.mubr.msk.bf16.mxu1 %vm1122_vm0, %v1123_v1  ;;  %917 = vmatpush3.bf16.msra.mxu1 %v1026_v28 }
 0x140   :  { %918 = vmatprep.subr.bf16.mxu1 %v1123_v1 }
 0x143   :  { %919 = vmatpush3.bf16.msra.mxu1 %v1027_v29 }
 0x144   :  { %920 = vmatprep.subr.bf16.mxu1 %v1123_v1 }
 0x147   :  { %921 = vmatpush3.bf16.msra.mxu1 %v1028_v30 }
 0x148   :  { %922 = vmatprep.subr.bf16.mxu1 %v1123_v1 }
 0x14b   :  { %923 = vmatpush3.bf16.msra.mxu1 %v1029_v31 }
 0x14c   :  { %924 = vmatprep.subr.bf16.mxu1 %v1123_v1 }
 0x14f   :  { %925 = vmatpush3.bf16.msra.mxu1 %v1030_v32 }
 0x150   :  { %926 = vmatprep.subr.bf16.mxu1 %v1123_v1 }
 0x153   :  { %927 = vmatpush3.bf16.msra.mxu1 %v1031_v44 }
 0x154   :  { %928 = vmatprep.subr.bf16.mxu1 %v1123_v1 }
 0x157   :  { %929 = vmatpush3.bf16.msra.mxu1 %v1032_v45 }
 0x158   :  { %930 = vmatprep.subr.bf16.mxu1 %v1123_v1 }
 0x15b   :  { %931 = vmatpush3.bf16.msra.mxu1 %v1033_v46 }
 0x211   :  { %v365_v36 = vpop.f32.mrb[4].mxu1 }
 0x212   :  { %v371_v37 = vpack.c.bf16 %v365_v36, %v365_v36  ;;  %v894_v38 = vpop.f32.mrb[5].mxu1 }
 0x213   :  { %v368_v39 = vpop.f32.mrb[6].mxu1 }
 0x214   :  { %v379_v40 = vadd.bf16 %v378_v35, %v371_v37  ;;  %v895_v41 = vpop.f32.mrb[7].mxu1 }
 0x216   :  { %v380_v42 = vmul.bf16 1009007652, %v379_v40 }
 0x218   :  { %v381_v43 = vmax.bf16 %v380_v42, %v379_v40 }
 0x21a   :  { %913 = vmatmul.mubr.bf16.vlgmr.msra.gmra.mrb[4].mxu0 %v381_v43 }
 0x21b   :  { %952 = vmatprep.mubr.msk.bf16.mxu0 %vm1122_vm0, %v1123_v1  ;;  %937 = vmatpush3.bf16.msra.mxu0 %v1034_v47 }
 0x21c   :  { %938 = vmatprep.subr.bf16.mxu0 %v1123_v1 }
 0x21f   :  { %939 = vmatpush3.bf16.msra.mxu0 %v1035_v48 }
 0x220   :  { %940 = vmatprep.subr.bf16.mxu0 %v1123_v1 }
 0x223   :  { %941 = vmatpush3.bf16.msra.mxu0 %v1036_v49 }
 0x224   :  { %942 = vmatprep.subr.bf16.mxu0 %v1123_v1 }
 0x227   :  { %943 = vmatpush3.bf16.msra.mxu0 %v1037_v50 }
 0x228   :  { %944 = vmatprep.subr.bf16.mxu0 %v1123_v1 }
 0x22b   :  { %945 = vmatpush3.bf16.msra.mxu0 %v1038_v51 }
 0x22c   :  { %946 = vmatprep.subr.bf16.mxu0 %v1123_v1 }
 0x22f   :  { %947 = vmatpush3.bf16.msra.mxu0 %v1039_v52 }
 0x230   :  { %948 = vmatprep.subr.bf16.mxu0 %v1123_v1 }
 0x233   :  { %949 = vmatpush3.bf16.msra.mxu0 %v1040_v53 }
 0x234   :  { %950 = vmatprep.subr.bf16.mxu0 %v1123_v1  ;;  %v1041_v1 = vld [vmem:[#allocation6 + $0xf8] sm:$0xff]  }
 0x237   :  { %951 = vmatpush3.bf16.msra.mxu0 %v1041_v1 }
 0x2ed   :  { %v481_v58 = vpop.f32.mrb[4].mxu0 }
 0x2ee   :  { %v487_v59 = vpack.c.bf16 %v481_v58, %v481_v58  ;;  %v914_v60 = vpop.f32.mrb[5].mxu0 }
 0x2ef   :  { %v484_v61 = vpop.f32.mrb[6].mxu0 }
 0x2f0   :  { %v496_v62 = vadd.bf16 %v495_v57, %v487_v59  ;;  %v915_v63 = vpop.f32.mrb[7].mxu0 }
 0x2f2   :  { %v497_v0 = vadd.bf16 %v496_v62, %v1218_v25 }
 0x2f4   :  { %v498_v2 = vmul.bf16 1009007652, %v497_v0 }
 0x2f6   :  { %v499_v3 = vmax.bf16 %v498_v2, %v497_v0 }
 0x2f8   :  { %933 = vmatmul.mubr.bf16.vlgmr.msra.gmra.mrb[8].mxu1 %v499_v3 }
 0x3cb   :  { %v599_v7 = vpop.f32.mrb[8].mxu1 }
 0x3cc   :  { %v605_v8 = vpack.c.bf16 %v599_v7, %v599_v7  ;;  %v934_v9 = vpop.f32.mrb[9].mxu1 }
 0x3cd   :  { %v602_v10 = vpop.f32.mrb[10].mxu1 }
 0x3ce   :  { %v613_v11 = vadd.bf16 %v612_v6, %v605_v8  ;;  %v935_v12 = vpop.f32.mrb[11].mxu1 }
 0x3d0   :  { %953 = vmatmul.mubr.bf16.vlgmr.msra.gmra.mrb[8].mxu0 %v613_v11 }
 0x4a3   :  { %v713_v18 = vpop.f32.mrb[8].mxu0 }
 0x4a4   :  { %v719_v19 = vpack.c.bf16 %v713_v18, %v713_v18  ;;  %v954_v20 = vpop.f32.mrb[9].mxu0 }
 0x4a5   :  { %v716_v21 = vpop.f32.mrb[10].mxu0 }
 0x4a6   :  { %v728_v22 = vadd.bf16 %v727_v17, %v719_v19  ;;  %v955_v23 = vpop.f32.mrb[11].mxu0 }
 0x4a8   :  { %v729_v24 = vmul.bf16 1009007652, %v728_v22 }
 0x4aa   :  { %v730_v25 = vmax.bf16 %v729_v24, %v728_v22 }
 0x4ac   :  { %v731_v27 = vunpack.c.l.bf16 %v730_v25 }
 0x4ae   :  { %v737_v28 = vmul.f32 %v787_v26, %v731_v27 }
 0x4b0   :  { %738 = vadd.xlane.f32.xlu0 %v737_v28 }
 0x53d   :  { %v739_v29 = vpop.xlane.xlu0 %738 }
 0x53e   :  { %v745_v30 = vadd.f32 %v788_v13, %v739_v29 }
 0x540   :  { %747 = vst.msk [vmem:[%s1264_s5] sm:$0xff] %vm746_vm2, %v745_v30 }
 0x541   :  { %752 = vsyncpa [#allocation3], 1 }
 0x542   :  { %753 = vsyncpa [#allocation5], 1 }

</bundles_post_ra>
